<compile_context>
chip_gen: v5e
topology: v5e:2x2
jax: 0.10.0
libtpu: 0.0.40
codegen_flags: <defaults>
</compile_context>

<pallas_src>
import functools
import math

import jax
import jax.numpy as jnp
from jax.experimental import pallas as pl
from jax.experimental.pallas import tpu as pltpu

_EPS = 1e-8  # default eps of torch.nn.functional.cosine_similarity


def _row_sum(a):
    """Sum an f32 [tile, D] slab along D -> [tile, 1].

    For D >= 128, offload the reduction to the MXU (matmul with ones) so the
    XLU never becomes the binding slot on v6e/v7x; otherwise use jnp.sum.
    """
    d = a.shape[-1]
    if d >= 128:
        ones = jnp.ones((d, 128), jnp.float32)
        return jnp.dot(a, ones, preferred_element_type=jnp.float32)[:, :1]
    return jnp.sum(a, axis=1, keepdims=True)


def _cosine_tile(x, y, eps):
    """Per-row cosine similarity of two f32 [tile, D] slabs -> [tile, 1]."""
    dot = _row_sum(x * y)
    nx = _row_sum(x * x)
    ny = _row_sum(y * y)
    eps2 = jnp.float32(eps) * jnp.float32(eps)
    # torch.cosine_similarity clamps the *product* of squared norms:
    #   cos = dot / sqrt(clamp_min(nx * ny, eps^2))
    return dot * jax.lax.rsqrt(jnp.maximum(nx * ny, eps2))


def _cos_rows_kernel(x_ref, y_ref, cos_ref, *, eps: float):
    x = x_ref[...].astype(jnp.float32)
    y = y_ref[...].astype(jnp.float32)
    cos_ref[...] = _cosine_tile(x, y, eps)


def _cos_rows_masked_kernel(x_ref, y_ref, m_ref, cos_ref, *, eps: float):
    m = m_ref[...].astype(jnp.float32)
    x = x_ref[...].astype(jnp.float32) * m
    y = y_ref[...].astype(jnp.float32) * m
    cos_ref[...] = _cosine_tile(x, y, eps)


def _round_up(x: int, m: int) -> int:
    return ((x + m - 1) // m) * m


def _tpu_vmem_capacity_bytes() -> int:
    try:
        return int(pltpu.get_tpu_info().vmem_capacity_bytes)
    except Exception:
        return 64 * 1024 * 1024  # conservative (v7x-sized) fallback


def _pick_row_tile(n_rows: int, d: int, itemsizes) -> int:
    """Generation-aware row-tile size for the streaming reduction."""
    # Minimum sublane tile for the narrowest operand dtype: 8 (f32), 16 (bf16),
    # 32 (int8/fp8).  Costs nothing for f32.
    granule = max(8, 32 // min(itemsizes))
    if n_rows <= granule:
        return max(n_rows, 1)  # single full-extent block

    cap = _tpu_vmem_capacity_bytes()
    budget = min(cap // 4, 24 * 1024 * 1024)  # ~16 MiB on v7x, 24 MiB v5e/v6e
    # Per-row working set: double-buffered native DMA slabs for every operand
    # plus ~5 full-tile f32 temporaries (upcasts + one product at a time).
    per_row = d * (2 * sum(itemsizes) + 20)
    t = budget // max(per_row, 1)
    # Keep >= ~8 tiles so v7x megacore sharding has work for both TensorCores.
    t = min(t, _round_up(pl.cdiv(n_rows, 8), granule), 4096)
    t = max(granule, (t // granule) * granule)
    return t


def reconstruction_loss(inputs, outputs, reduction: str = "mean",
                        mask=None, labels=None):
    """JAX/Pallas equivalent of ReconstructionLoss.forward."""
    assert inputs.shape == outputs.shape
    if mask is not None:
        assert mask.shape == inputs.shape
    if reduction not in ("mean", "none"):
        raise ValueError("Unknown reduction: {}".format(reduction))

    lead_shape = inputs.shape[:-1]
    d = inputs.shape[-1]
    r = int(math.prod(lead_shape))  # math.prod(()) == 1

    ops = [inputs.reshape(r, d), outputs.reshape(r, d)]
    if mask is not None:
        ops.append(mask.reshape(r, d))
    itemsizes = [jnp.dtype(a.dtype).itemsize for a in ops]

    tile_r = _pick_row_tile(r, d, itemsizes)
    grid = (pl.cdiv(r, tile_r),)  # ragged last block; OOB rows are discarded

    cap = _tpu_vmem_capacity_bytes()
    vmem_limit = min(cap // 2, 48 * 1024 * 1024)

    row_spec = pl.BlockSpec((tile_r, d), lambda i: (i, 0))
    kernel = functools.partial(
        _cos_rows_masked_kernel if mask is not None else _cos_rows_kernel,
        eps=_EPS,
    )

    cos = pl.pallas_call(
        kernel,
        out_shape=jax.ShapeDtypeStruct((r, 1), jnp.float32),
        grid=grid,
        in_specs=[row_spec] * len(ops),
        out_specs=pl.BlockSpec((tile_r, 1), lambda i: (i, 0)),
        compiler_params=pltpu.CompilerParams(
            dimension_semantics=("parallel",),
            vmem_limit_bytes=vmem_limit,
        ),
    )(*ops)

    cos = cos[:, 0]
    if reduction == "mean":
        return jnp.float32(1.0) - jnp.mean(cos)
    # reduction == "none": ones_like(cos) - cos, with the original leading shape
    return (jnp.float32(1.0) - cos).reshape(lead_shape)


def _reference_loss(inputs, outputs, reduction="mean", mask=None, eps=_EPS):
    """Pure-JAX reference mirroring F.cosine_similarity + the module."""
    if mask is not None:
        inputs = inputs * mask
        outputs = outputs * mask
    dot = jnp.sum(inputs * outputs, axis=-1)
    nx = jnp.sum(inputs * inputs, axis=-1)
    ny = jnp.sum(outputs * outputs, axis=-1)
    cos = dot / jnp.sqrt(jnp.maximum(nx * ny, eps * eps))
    if reduction == "mean":
        return 1.0 - jnp.mean(cos)
    return 1.0 - cos


if __name__ == "__main__":
    key = jax.random.PRNGKey(0)
    k1, k2, k3, k4, k5 = jax.random.split(key, 5)

    # EEG-like shapes: [batch, channels, time] with time on the lane axis.
    batch, channels, time = 2, 4, 128
    inputs = jax.random.normal(k1, (batch, channels, time), dtype=jnp.float32)
    outputs = inputs + 0.1 * jax.random.normal(k2, (batch, channels, time),
                                               dtype=jnp.float32)
    mask = (jax.random.uniform(k3, (batch, channels, time)) > 0.25).astype(jnp.float32)

    loss_mean = reconstruction_loss(inputs, outputs, reduction="mean")
    loss_none = reconstruction_loss(inputs, outputs, reduction="none")
    loss_masked = reconstruction_loss(inputs, outputs, reduction="mean", mask=mask)
    jax.block_until_ready((loss_mean, loss_none, loss_masked))

    assert loss_none.shape == (batch, channels), loss_none.shape
    assert jnp.allclose(loss_mean, _reference_loss(inputs, outputs, "mean"),
                        rtol=1e-5, atol=1e-5)
    assert jnp.allclose(loss_none, _reference_loss(inputs, outputs, "none"),
                        rtol=1e-5, atol=1e-5)
    assert jnp.allclose(loss_masked, _reference_loss(inputs, outputs, "mean", mask),
                        rtol=1e-5, atol=1e-5)

    # Second case: row count (3*7=21) not a tile multiple -> exercises the
    # ragged last block (no jnp.pad) across a multi-tile grid.
    b2, c2, t2 = 3, 7, 128
    x2 = jax.random.normal(k4, (b2, c2, t2), dtype=jnp.float32)
    y2 = x2 + 0.2 * jax.random.normal(k5, (b2, c2, t2), dtype=jnp.float32)
    loss2 = reconstruction_loss(x2, y2, reduction="none")
    jax.block_until_ready(loss2)
    assert loss2.shape == (b2, c2), loss2.shape
    assert jnp.allclose(loss2, _reference_loss(x2, y2, "none"),
                        rtol=1e-5, atol=1e-5)

    print("KERNEL_OK")
</pallas_src>

<mosaic_0001>
module attributes {stable_mosaic.version = 11 : i64} {
  func.func @_cos_rows_kernel(%arg0: i32, %arg1: memref<8x128xf32, #tpu.memory_space<vmem>>, %arg2: memref<8x128xf32, #tpu.memory_space<vmem>>, %arg3: memref<8x1xf32, #tpu.memory_space<vmem>>) attributes {dimension_semantics = [#tpu.dimension_semantics<parallel>], iteration_bounds = array<i64: 1>, scalar_prefetch = 0 : i64, scratch_operands = 0 : i64, tpu.core_type = #tpu.core_type<tc>, window_params = [{transform_indices = @transform_0, window_bounds = array<i64: 8, 128>}, {transform_indices = @transform_1, window_bounds = array<i64: 8, 128>}, {transform_indices = @transform_2, window_bounds = array<i64: 8, 1>}]} {
    %c0 = arith.constant 0 : index
    %c0_0 = arith.constant 0 : index
    %0 = vector.load %arg1[%c0, %c0_0] : memref<8x128xf32, #tpu.memory_space<vmem>>, vector<8x128xf32>
    %c0_1 = arith.constant 0 : index
    %c0_2 = arith.constant 0 : index
    %1 = vector.load %arg2[%c0_1, %c0_2] : memref<8x128xf32, #tpu.memory_space<vmem>>, vector<8x128xf32>
    %2 = arith.mulf %0, %1 : vector<8x128xf32>
    %cst = arith.constant 1.000000e+00 : f32
    %3 = vector.broadcast %cst : f32 to vector<128x128xf32>
    %cst_3 = arith.constant dense<0.000000e+00> : vector<8x128xf32>
    %4 = tpu.matmul %2, %3, %cst_3 {dimension_numbers = #tpu.dot_dimension_numbers<[1], [0], [0], [1], [0, 0, 1, 1], [], []>} : vector<8x128xf32>, vector<128x128xf32>, vector<8x128xf32> -> vector<8x128xf32>
    %5 = vector.extract_strided_slice %4 {offsets = [0, 0], sizes = [8, 1], strides = [1, 1]} : vector<8x128xf32> to vector<8x1xf32>
    %6 = arith.mulf %0, %0 : vector<8x128xf32>
    %cst_4 = arith.constant 1.000000e+00 : f32
    %7 = vector.broadcast %cst_4 : f32 to vector<128x128xf32>
    %cst_5 = arith.constant dense<0.000000e+00> : vector<8x128xf32>
    %8 = tpu.matmul %6, %7, %cst_5 {dimension_numbers = #tpu.dot_dimension_numbers<[1], [0], [0], [1], [0, 0, 1, 1], [], []>} : vector<8x128xf32>, vector<128x128xf32>, vector<8x128xf32> -> vector<8x128xf32>
    %9 = vector.extract_strided_slice %8 {offsets = [0, 0], sizes = [8, 1], strides = [1, 1]} : vector<8x128xf32> to vector<8x1xf32>
    %10 = arith.mulf %1, %1 : vector<8x128xf32>
    %cst_6 = arith.constant 1.000000e+00 : f32
    %11 = vector.broadcast %cst_6 : f32 to vector<128x128xf32>
    %cst_7 = arith.constant dense<0.000000e+00> : vector<8x128xf32>
    %12 = tpu.matmul %10, %11, %cst_7 {dimension_numbers = #tpu.dot_dimension_numbers<[1], [0], [0], [1], [0, 0, 1, 1], [], []>} : vector<8x128xf32>, vector<128x128xf32>, vector<8x128xf32> -> vector<8x128xf32>
    %13 = vector.extract_strided_slice %12 {offsets = [0, 0], sizes = [8, 1], strides = [1, 1]} : vector<8x128xf32> to vector<8x1xf32>
    %cst_8 = arith.constant 9.99999993E-9 : f32
    %cst_9 = arith.constant 9.99999993E-9 : f32
    %14 = arith.mulf %cst_8, %cst_9 : f32
    %15 = arith.mulf %9, %13 : vector<8x1xf32>
    %16 = vector.broadcast %14 : f32 to vector<8x1xf32>
    %17 = arith.maximumf %15, %16 : vector<8x1xf32>
    %18 = math.rsqrt %17 : vector<8x1xf32>
    %19 = arith.mulf %5, %18 : vector<8x1xf32>
    %c0_10 = arith.constant 0 : index
    %c0_11 = arith.constant 0 : index
    %20 = vector.load %arg3[%c0_10, %c0_11] : memref<8x1xf32, #tpu.memory_space<vmem>>, vector<8x1xf32>
    tpu.vector_store %arg3[%c0_10, %c0_11], %19 {strides = array<i32>} : memref<8x1xf32, #tpu.memory_space<vmem>>, vector<8x1xf32>,
    return
  }
  func.func @transform_0(%arg0: i32) -> (i32, i32) {
    %c0_i32 = arith.constant 0 : i32
    %c0_i32_0 = arith.constant 0 : i32
    return %arg0, %c0_i32 : i32, i32
  }
  func.func @transform_1(%arg0: i32) -> (i32, i32) {
    %c0_i32 = arith.constant 0 : i32
    %c0_i32_0 = arith.constant 0 : i32
    return %arg0, %c0_i32 : i32, i32
  }
  func.func @transform_2(%arg0: i32) -> (i32, i32) {
    %c0_i32 = arith.constant 0 : i32
    %c0_i32_0 = arith.constant 0 : i32
    return %arg0, %c0_i32 : i32, i32
  }
}

</mosaic_0001>

<bundles_post_ra>
// kernel: tpu_custom_call.1
= control target key start
LH: loop header
LB: loop body
LE: loop exit
PB: predicated region body
PF: predicated region fallthrough
CT: control target
= control target key end

     0   :  { %7 = vsyncpa [#allocation3], 0  ;;  %s209_s0 = inlined_call_operand.hbm [shape: f32[8,128], index: 0, kind: input, shape index: {}]   ;;  %s210_s1 = inlined_call_operand.hbm [shape: f32[8,128], index: 1, kind: input, shape index: {}]   ;;  %s211_s2 = inlined_call_operand.vmem [shape: f32[8,1], index: 2, kind: output, shape index: {}]  }
   0x1   :  { %s14_s11 = sshll.u32 %s209_s0, 4  ;;  %s15_s11 = int_to_ptr.hbm [resolvable:$true] %s14_s11 }
   0x2   :  { %8 = vsyncpa [#allocation5], 0  ;;  %s182_s12 = smov [#allocation2]   ;;  %s25_s16 = sshll.u32 %s210_s1, 4  ;;  %s26_s16 = int_to_ptr.hbm [resolvable:$true] %s25_s16 }
   0x3   :  { %s16_s13 = sshll.u32 %s182_s12, 4  ;;  %s183_s17 = smov [#allocation4]   ;;  %s17_s13 = int_to_ptr.vmem [resolvable:$true] %s16_s13 }
   0x4   :  { %19 = dma.hbm_to_vmem [thread:$0]  %s15_s11, 128, %s17_s13, [#allocation3]  }
   0x5   :  { %s27_s18 = sshll.u32 %s183_s17, 4  ;;  %s28_s18 = int_to_ptr.vmem [resolvable:$true] %s27_s18 }
   0x6   :  { %30 = dma.hbm_to_vmem [thread:$0]  %s26_s16, 128, %s28_s18, [#allocation5]  }
   0x7   :  { %178 = dma.done.wait [#allocation3], 128  }
   0x8   :  { %179 = vsyncadd [#allocation3], 4294967168 }
   0x9   :  { %180 = dma.done.wait [#allocation5], 128  }
   0xa   :  { %181 = vsyncadd [#allocation5], 4294967168  ;;  %v184_v0 = vmov 1.0   ;;  %v40_v1 = vld [vmem:[#allocation4] sm:$0xff]  ;;  %v39_v2 = vld [vmem:[#allocation2] sm:$0xff]  ;;  %vm117_vm3 = vcmask 7168  }
   0xb   :  { %84 = vmatpush.msra.mxu2 %v184_v0  ;;  %63 = vmatpush.msra.mxu1 %v184_v0  ;;  %v83_v3 = vmul.f32 %v40_v1, %v40_v1  ;;  %v62_v4 = vmul.f32 %v39_v2, %v39_v2  ;;  %v41_v5 = vmul.f32 %v40_v1, %v39_v2 }
   0xc   :  { %42 = vmatpush.msra.mxu0 %v184_v0 }
   0xd   :  { %85 = vmatpush.msra.mxu2 %v184_v0  ;;  %64 = vmatpush.msra.mxu1 %v184_v0 }
   0xe   :  { %43 = vmatpush.msra.mxu0 %v184_v0 }
   0xf   :  { %86 = vmatpush.msra.mxu2 %v184_v0  ;;  %65 = vmatpush.msra.mxu1 %v184_v0 }
  0x10   :  { %44 = vmatpush.msra.mxu0 %v184_v0 }
  0x11   :  { %87 = vmatpush.msra.mxu2 %v184_v0  ;;  %66 = vmatpush.msra.mxu1 %v184_v0 }
  0x12   :  { %45 = vmatpush.msra.mxu0 %v184_v0 }
  0x13   :  { %88 = vmatpush.msra.mxu2 %v184_v0  ;;  %67 = vmatpush.msra.mxu1 %v184_v0 }
  0x14   :  { %46 = vmatpush.msra.mxu0 %v184_v0 }
  0x15   :  { %89 = vmatpush.msra.mxu2 %v184_v0  ;;  %68 = vmatpush.msra.mxu1 %v184_v0 }
  0x16   :  { %47 = vmatpush.msra.mxu0 %v184_v0 }
  0x17   :  { %90 = vmatpush.msra.mxu2 %v184_v0  ;;  %69 = vmatpush.msra.mxu1 %v184_v0 }
  0x18   :  { %48 = vmatpush.msra.mxu0 %v184_v0 }
  0x19   :  { %91 = vmatpush.msra.mxu2 %v184_v0  ;;  %70 = vmatpush.msra.mxu1 %v184_v0 }
  0x1a   :  { %49 = vmatpush.msra.mxu0 %v184_v0 }
  0x1b   :  { %92 = vmatpush.msra.mxu2 %v184_v0  ;;  %71 = vmatpush.msra.mxu1 %v184_v0 }
  0x1c   :  { %50 = vmatpush.msra.mxu0 %v184_v0 }
  0x1d   :  { %93 = vmatpush.msra.mxu2 %v184_v0  ;;  %72 = vmatpush.msra.mxu1 %v184_v0 }
  0x1e   :  { %51 = vmatpush.msra.mxu0 %v184_v0 }
  0x1f   :  { %94 = vmatpush.msra.mxu2 %v184_v0  ;;  %73 = vmatpush.msra.mxu1 %v184_v0 }
  0x20   :  { %52 = vmatpush.msra.mxu0 %v184_v0 }
  0x21   :  { %95 = vmatpush.msra.mxu2 %v184_v0  ;;  %74 = vmatpush.msra.mxu1 %v184_v0 }
  0x22   :  { %53 = vmatpush.msra.mxu0 %v184_v0 }
  0x23   :  { %96 = vmatpush.msra.mxu2 %v184_v0  ;;  %75 = vmatpush.msra.mxu1 %v184_v0 }
  0x24   :  { %54 = vmatpush.msra.mxu0 %v184_v0 }
  0x25   :  { %97 = vmatpush.msra.mxu2 %v184_v0  ;;  %76 = vmatpush.msra.mxu1 %v184_v0 }
  0x26   :  { %55 = vmatpush.msra.mxu0 %v184_v0 }
  0x27   :  { %98 = vmatpush.msra.mxu2 %v184_v0  ;;  %77 = vmatpush.msra.mxu1 %v184_v0 }
  0x28   :  { %56 = vmatpush.msra.mxu0 %v184_v0 }
  0x29   :  { %99 = vmatpush.msra.mxu2 %v184_v0  ;;  %78 = vmatpush.msra.mxu1 %v184_v0 }
  0x2a   :  { %100 = vmatmul.f32.vlgmr.msra.gmra.mxu2 %v83_v3  ;;  %79 = vmatmul.f32.vlgmr.msra.gmra.mxu1 %v62_v4 }
  0x2b   :  { %57 = vmatpush.msra.mxu0 %v184_v0 }
  0x2c   :  { %58 = vmatmul.f32.vlgmr.msra.gmra.mxu0 %v41_v5 }
  0xa7   :  { %v80_v6 = vpop.f32.mrf.mxu1 }
  0xa9   :  { %v59_v15 = vpop.f32.mrf.mxu0 }
  0xad   :  { %v101_v7 = vpop.f32.mrf.mxu2 }
  0xae   :  { %v104_v8 = vmul.f32 %v101_v7, %v80_v6 }
  0xb0   :  { %v105_v9 = vmax.f32 %v104_v8, 1e-16 }
  0xb2   :  { %128 = vrsqrt.f32 %v105_v9  ;;  %vm112_vm1 = vweird.f32 %v105_v9 }
  0xb8   :  { %v129_v10 = vpop.eup %128 }
  0xb9   :  { %v107_v11 = vmul.f32 %v129_v10, %v105_v9  ;;  %vm113_vm0 = vweird.f32 %v129_v10 }
  0xba   :  { %vm114_vm2 = vmor %vm112_vm1, %vm113_vm0 }
  0xbb   :  { %v108_v12 = vmul.f32 %v129_v10, %v107_v11 }
  0xbd   :  { %v109_v13 = vmul.f32 0.5, %v108_v12 }
  0xbf   :  { %v110_v14 = vsub.f32 1.5, %v109_v13 }
  0xc1   :  { %v111_v16 = vmul.f32 %v129_v10, %v110_v14 }
  0xc3   :  { %v115_v17 = vsel %vm114_vm2, %v129_v10, %v111_v16 }
  0xc4   :  { %v116_v18 = vmul.f32 %v115_v17, %v59_v15 }
  0xc6   :  { %118 = vst.msk [vmem:[%s211_s2] sm:$0xff] %vm117_vm3, %v116_v18 }
  0xc7   :  { %123 = vsyncpa [#allocation3], 1 }
  0xc8   :  { %124 = vsyncpa [#allocation5], 1 }

</bundles_post_ra>
